<compile_context>
chip_gen: v5e
topology: v5e:2x2
jax: 0.10.0
libtpu: 0.0.40
codegen_flags: <defaults>
</compile_context>

<pallas_src>
import functools

import jax
import jax.numpy as jnp
from jax.experimental import pallas as pl
from jax.experimental.pallas import tpu as pltpu


def _round_up(v, m):
    return ((v + m - 1) // m) * m


# ----------------------------------------------------------------------------
# Kernel body: one (tile_m, D) slab of x -> one (tile_m, mid) slab of output.
# ----------------------------------------------------------------------------
def _se_mask_kernel(x_ref, wcat_ref, b1_ref, w2h_ref, b2_ref, o_ref, *, midp, mid):
    x = x_ref[...]                                               # (TM, D)
    # Fused x-side matmul: [x@W1^T | x@W2_x^T] in one MXU pass (f32 accumulate).
    xw = jnp.dot(x, wcat_ref[...], preferred_element_type=jnp.float32)  # (TM, 2*midp)
    h = jnp.maximum(xw[:, :midp] + b1_ref[...], 0.0)             # fc1 + ReLU (f32)
    # fc2 on concat([x, h]) == x @ W2_x^T + h @ W2_h^T + b2
    y = (xw[:, midp:]
         + jnp.dot(h.astype(w2h_ref.dtype), w2h_ref[...],
                   preferred_element_type=jnp.float32)
         + b2_ref[...])
    # ReLU6 / 6, cast, store only the real (unpadded) mid columns.
    mask = jnp.clip(y, 0.0, 6.0) * (1.0 / 6.0)
    o_ref[...] = mask[:, :mid].astype(o_ref.dtype)


# ----------------------------------------------------------------------------
# One-time parameter preparation (NOT inside the jitted forward).
#   w1: (mid, D)  b1: (mid,)  w2: (mid, 2*mid)  b2: (mid,)   (torch layout)
# Returns ((w_cat, b1, w2h_t, b2), mid):
#   w_cat = [W1^T | W2[:, :D]^T] zero-padded on the lane axis to midp=ceil128(mid)
#   w2h_t = W2[:, D:]^T zero-padded to (midp, midp); biases zero-padded, f32.
# ----------------------------------------------------------------------------
def prepare_se_mask_params(w1, b1, w2, b2, *, dtype=None):
    mid, D = w1.shape
    assert D == mid, "se_mask only typechecks when input_dimension == mid_dimension"
    assert w2.shape == (mid, 2 * mid) and b1.shape == (mid,) and b2.shape == (mid,)

    if dtype is not None:                      # e.g. jnp.bfloat16 for bf16 models
        w1 = w1.astype(dtype)
        w2 = w2.astype(dtype)

    midp = _round_up(mid, 128)                 # lane-dense internal width
    pad = midp - mid

    w1_t = jnp.pad(w1.T, ((0, 0), (0, pad)))               # (D,    midp)
    w2x_t = jnp.pad(w2[:, :D].T, ((0, 0), (0, pad)))        # (D,    midp)
    w_cat = jnp.concatenate([w1_t, w2x_t], axis=1)           # (D,  2*midp)  fused
    w2h_t = jnp.pad(w2[:, D:].T, ((0, pad), (0, pad)))       # (midp, midp)
    b1_r = jnp.pad(b1.astype(jnp.float32), (0, pad)).reshape(1, midp)
    b2_r = jnp.pad(b2.astype(jnp.float32), (0, pad)).reshape(1, midp)

    return (w_cat, b1_r, w2h_t, b2_r), mid


# ----------------------------------------------------------------------------
# Generation-aware VMEM budget.
# ----------------------------------------------------------------------------
def _vmem_limits():
    cap = 64 * 1024 * 1024                     # conservative default (v7x-class)
    try:
        info = pltpu.get_tpu_info()
        for attr in ("vmem_capacity_bytes", "vmem_bytes", "vmem_size_bytes"):
            v = getattr(info, attr, None)
            if v:
                cap = int(v)
                break
    except Exception:
        pass
    # Leave headroom for Mosaic internal scratch:
    #   64 MiB parts (v7x)   -> ~54 MiB limit
    #   128 MiB parts (v5e/v6e) -> ~108 MiB limit
    limit = min(int(cap * 0.85), cap - (8 << 20))
    return limit, cap


def _select_tile_m(M, D, mid, midp, x_itemsize, w_itemsize, vmem_limit,
                   single_buffer_weights, x_buffer_count):
    row_align = 8 if x_itemsize >= 4 else (16 if x_itemsize == 2 else 32)
    wbuf = 1 if single_buffer_weights else 2
    weight_bytes = wbuf * ((D * 2 * midp + midp * midp) * w_itemsize + 2 * midp * 4)
    # Per-row VMEM: streamed x (x_buffer_count deep), double-buffered out,
    # f32 intermediates (xw: 2*midp, h: midp, y/mask: midp).
    per_row = x_buffer_count * D * x_itemsize + 2 * mid * x_itemsize + 4 * midp * 4
    budget = vmem_limit - weight_bytes - (4 << 20)      # misc headroom
    cap_rows = 1024 if vmem_limit >= (96 << 20) else 512
    if budget <= per_row * row_align:
        # TODO(synk): very large D needs a K-split ("arbitrary" axis + f32 VMEM
        # accumulator); fall back to the minimum row tile here.
        tile_m = row_align
    else:
        tile_m = min(cap_rows, (budget // per_row) // row_align * row_align)
        tile_m = max(tile_m, row_align)
    if tile_m >= M:
        if M > 2 * row_align:
            # Keep >= 2 grid steps so both v7x TensorCores get work and the
            # x/out DMAs actually pipeline.  Neutral on v5e/v6e.
            tile_m = _round_up(-(-M // 2), row_align)
        else:
            tile_m = M                                   # full-extent block is legal
    return tile_m


# ----------------------------------------------------------------------------
# pallas_call wrapper (jitted; all shape/config knobs static).
# ----------------------------------------------------------------------------
@functools.partial(
    jax.jit,
    static_argnames=("mid", "midp", "tile_m", "single_buffer_weights",
                     "x_buffer_count", "vmem_limit_bytes"),
)
def _se_mask_call(x2d, w_cat, b1, w2h, b2, *, mid, midp, tile_m,
                  single_buffer_weights, x_buffer_count, vmem_limit_bytes):
    M, D = x2d.shape

    if single_buffer_weights:
        def wspec(shape):
            # Constant index_map => resident block; no prefetch needed, so a
            # single buffer halves the weights' VMEM footprint.
            return pl.BlockSpec(shape, lambda i: (0, 0), pipeline_mode=pl.Buffered(1))
    else:
        def wspec(shape):
            return pl.BlockSpec(shape, lambda i: (0, 0))

    if x_buffer_count != 2:
        x_spec = pl.BlockSpec((tile_m, D), lambda i: (i, 0),
                              pipeline_mode=pl.Buffered(x_buffer_count))
    else:
        x_spec = pl.BlockSpec((tile_m, D), lambda i: (i, 0))

    grid = (pl.cdiv(M, tile_m),)

    return pl.pallas_call(
        functools.partial(_se_mask_kernel, midp=midp, mid=mid),
        out_shape=jax.ShapeDtypeStruct((M, mid), x2d.dtype),
        grid_spec=pltpu.PrefetchScalarGridSpec(
            num_scalar_prefetch=0,
            grid=grid,
            in_specs=[
                x_spec,                          # x rows     (streamed)
                wspec((D, 2 * midp)),            # [W1^T | W2_x^T]  (resident)
                wspec((1, midp)),                # b1               (resident)
                wspec((midp, midp)),             # W2_h^T           (resident)
                wspec((1, midp)),                # b2               (resident)
            ],
            out_specs=pl.BlockSpec((tile_m, mid), lambda i: (i, 0)),
        ),
        compiler_params=pltpu.CompilerParams(
            dimension_semantics=("parallel",),
            vmem_limit_bytes=vmem_limit_bytes,
        ),
    )(x2d, w_cat, b1, w2h, b2)


# Flips to False once if pipeline_mode=pl.Buffered is rejected by this JAX
# build; the fallback config is the previously validated default-buffered one.
_PIPELINE_MODE_OK = True


# ----------------------------------------------------------------------------
# Forward.  x: (..., D).  params: output of prepare_se_mask_params.
# ----------------------------------------------------------------------------
def se_mask_forward(x, params, *, mid, tile_m=None):
    global _PIPELINE_MODE_OK
    w_cat, b1_r, w2h_t, b2_r = params
    D = x.shape[-1]
    midp = w2h_t.shape[0]
    assert w_cat.shape == (D, 2 * midp)

    x2d = x.reshape(-1, D)
    M = x2d.shape[0]
    x_itemsize = jnp.dtype(x2d.dtype).itemsize
    w_itemsize = jnp.dtype(w_cat.dtype).itemsize
    row_align = 8 if x_itemsize >= 4 else (16 if x_itemsize == 2 else 32)

    vmem_limit, vmem_cap = _vmem_limits()
    # Deeper x buffering on 64 MiB-class parts (v7x): latency-exposed regime.
    want_x_buffers = 3 if vmem_cap <= (64 << 20) else 2

    def run(single_buffer, x_buffers):
        if tile_m is not None:
            tm = min(tile_m, M)
            if tm != M:
                tm = max(row_align, (tm // row_align) * row_align)
        else:
            tm = _select_tile_m(M, D, mid, midp, x_itemsize, w_itemsize,
                                vmem_limit, single_buffer, x_buffers)
        return _se_mask_call(
            x2d, w_cat, b1_r, w2h_t, b2_r,
            mid=mid, midp=midp, tile_m=tm,
            single_buffer_weights=single_buffer,
            x_buffer_count=x_buffers,
            vmem_limit_bytes=vmem_limit)

    use_pipeline_mode = _PIPELINE_MODE_OK
    try:
        out2d = run(use_pipeline_mode, want_x_buffers if use_pipeline_mode else 2)
    except Exception:
        if not use_pipeline_mode:
            raise
        _PIPELINE_MODE_OK = False
        out2d = run(False, 2)

    return out2d.reshape(*x.shape[:-1], mid)


# ----------------------------------------------------------------------------
# Reference + init helpers (match the torch module's initialization scheme).
# ----------------------------------------------------------------------------
def _xavier_normal(key, shape):
    fan_out, fan_in = shape  # torch Linear weight: (out_features, in_features)
    std = (2.0 / (fan_in + fan_out)) ** 0.5
    return std * jax.random.normal(key, shape, dtype=jnp.float32)


def _linear_bias_init(key, fan_in, out_features):
    # torch default Linear bias init: U(-1/sqrt(fan_in), 1/sqrt(fan_in))
    bound = 1.0 / (fan_in ** 0.5)
    return jax.random.uniform(key, (out_features,), jnp.float32, -bound, bound)


def _reference(x, w1, b1, w2, b2):
    h = jax.nn.relu(x @ w1.T + b1)
    c = jnp.concatenate([x, h], axis=-1)
    y = c @ w2.T + b2
    return jnp.clip(y, 0.0, 6.0) / 6.0


if __name__ == "__main__":
    input_dimension = 32
    mid_dimension = 32   # must equal input_dimension (see module note)
    batch, seq = 2, 8

    key = jax.random.PRNGKey(0)
    kx, kw1, kb1, kw2, kb2, kx2 = jax.random.split(key, 6)

    x = jax.random.normal(kx, (batch, seq, input_dimension), dtype=jnp.float32)
    w1 = _xavier_normal(kw1, (mid_dimension, input_dimension))
    b1 = _linear_bias_init(kb1, input_dimension, mid_dimension)
    w2 = _xavier_normal(kw2, (mid_dimension, mid_dimension * 2))
    b2 = _linear_bias_init(kb2, mid_dimension * 2, mid_dimension)

    # One-time weight prep (transpose / fc2 split / fuse / lane padding).
    # For bf16 models: prepare_se_mask_params(..., dtype=jnp.bfloat16) and feed
    # bf16 x (f32 accumulation kept; loosen test tolerance accordingly).
    params, mid = prepare_se_mask_params(w1, b1, w2, b2)
    params = jax.block_until_ready(params)

    # Small case (single grid step).
    out = jax.block_until_ready(se_mask_forward(x, params, mid=mid))
    ref = _reference(x, w1, b1, w2, b2)
    assert out.shape == (batch, seq, mid_dimension)
    assert jnp.allclose(out, ref, atol=1e-5, rtol=1e-5), "mismatch vs reference (case 1)"

    # Second case: multi-step grid with a partial (masked) last row tile.
    x2 = jax.random.normal(kx2, (5, 8, input_dimension), dtype=jnp.float32)
    out2 = jax.block_until_ready(se_mask_forward(x2, params, mid=mid))
    ref2 = _reference(x2, w1, b1, w2, b2)
    assert out2.shape == (5, 8, mid_dimension)
    assert jnp.allclose(out2, ref2, atol=1e-5, rtol=1e-5), "mismatch vs reference (case 2)"

    print("KERNEL_OK")
</pallas_src>

<mosaic_0001>
module attributes {stable_mosaic.version = 11 : i64} {
  func.func @_se_mask_kernel(%arg0: i32, %arg1: memref<16x32xf32, #tpu.memory_space<vmem>>, %arg2: memref<32x256xf32, #tpu.memory_space<vmem>>, %arg3: memref<1x128xf32, #tpu.memory_space<vmem>>, %arg4: memref<128x128xf32, #tpu.memory_space<vmem>>, %arg5: memref<1x128xf32, #tpu.memory_space<vmem>>, %arg6: memref<16x32xf32, #tpu.memory_space<vmem>>) attributes {dimension_semantics = [#tpu.dimension_semantics<parallel>], iteration_bounds = array<i64: 1>, scalar_prefetch = 0 : i64, scratch_operands = 0 : i64, tpu.core_type = #tpu.core_type<tc>, window_params = [{transform_indices = @transform_0, window_bounds = array<i64: 16, 32>}, {pipeline_mode = #tpu.pipeline_mode<synchronous>, transform_indices = @transform_1, window_bounds = array<i64: 32, 256>}, {pipeline_mode = #tpu.pipeline_mode<synchronous>, transform_indices = @transform_2, window_bounds = array<i64: 1, 128>}, {pipeline_mode = #tpu.pipeline_mode<synchronous>, transform_indices = @transform_3, window_bounds = array<i64: 128, 128>}, {pipeline_mode = #tpu.pipeline_mode<synchronous>, transform_indices = @transform_4, window_bounds = array<i64: 1, 128>}, {transform_indices = @transform_5, window_bounds = array<i64: 16, 32>}]} {
    %c0 = arith.constant 0 : index
    %c0_0 = arith.constant 0 : index
    %0 = vector.load %arg1[%c0, %c0_0] : memref<16x32xf32, #tpu.memory_space<vmem>>, vector<16x32xf32>
    %c0_1 = arith.constant 0 : index
    %c0_2 = arith.constant 0 : index
    %1 = vector.load %arg2[%c0_1, %c0_2] : memref<32x256xf32, #tpu.memory_space<vmem>>, vector<32x256xf32>
    %cst = arith.constant dense<0.000000e+00> : vector<16x256xf32>
    %2 = tpu.matmul %0, %1, %cst {dimension_numbers = #tpu.dot_dimension_numbers<[1], [0], [0], [1], [0, 0, 1, 1], [], []>} : vector<16x32xf32>, vector<32x256xf32>, vector<16x256xf32> -> vector<16x256xf32>
    %3 = vector.extract_strided_slice %2 {offsets = [0, 0], sizes = [16, 128], strides = [1, 1]} : vector<16x256xf32> to vector<16x128xf32>
    %c0_3 = arith.constant 0 : index
    %c0_4 = arith.constant 0 : index
    %4 = vector.load %arg3[%c0_3, %c0_4] : memref<1x128xf32, #tpu.memory_space<vmem>>, vector<1x128xf32>
    %5 = vector.broadcast %4 : vector<1x128xf32> to vector<16x128xf32>
    %6 = arith.addf %3, %5 : vector<16x128xf32>
    %cst_5 = arith.constant 0.000000e+00 : f32
    %7 = vector.broadcast %cst_5 : f32 to vector<16x128xf32>
    %8 = arith.maximumf %6, %7 : vector<16x128xf32>
    %9 = vector.extract_strided_slice %2 {offsets = [0, 128], sizes = [16, 128], strides = [1, 1]} : vector<16x256xf32> to vector<16x128xf32>
    %c0_6 = arith.constant 0 : index
    %c0_7 = arith.constant 0 : index
    %10 = vector.load %arg4[%c0_6, %c0_7] : memref<128x128xf32, #tpu.memory_space<vmem>>, vector<128x128xf32>
    %cst_8 = arith.constant dense<0.000000e+00> : vector<16x128xf32>
    %11 = tpu.matmul %8, %10, %cst_8 {dimension_numbers = #tpu.dot_dimension_numbers<[1], [0], [0], [1], [0, 0, 1, 1], [], []>} : vector<16x128xf32>, vector<128x128xf32>, vector<16x128xf32> -> vector<16x128xf32>
    %12 = arith.addf %9, %11 : vector<16x128xf32>
    %c0_9 = arith.constant 0 : index
    %c0_10 = arith.constant 0 : index
    %13 = vector.load %arg5[%c0_9, %c0_10] : memref<1x128xf32, #tpu.memory_space<vmem>>, vector<1x128xf32>
    %14 = vector.broadcast %13 : vector<1x128xf32> to vector<16x128xf32>
    %15 = arith.addf %12, %14 : vector<16x128xf32>
    %cst_11 = arith.constant 0.000000e+00 : f32
    %cst_12 = arith.constant 6.000000e+00 : f32
    %16 = vector.broadcast %cst_11 : f32 to vector<16x128xf32>
    %17 = arith.maximumf %16, %15 : vector<16x128xf32>
    %18 = vector.broadcast %cst_12 : f32 to vector<16x128xf32>
    %19 = arith.minimumf %18, %17 : vector<16x128xf32>
    %cst_13 = arith.constant 0.166666672 : f32
    %20 = vector.broadcast %cst_13 : f32 to vector<16x128xf32>
    %21 = arith.mulf %19, %20 : vector<16x128xf32>
    %22 = vector.extract_strided_slice %21 {offsets = [0, 0], sizes = [16, 32], strides = [1, 1]} : vector<16x128xf32> to vector<16x32xf32>
    %c0_14 = arith.constant 0 : index
    %c0_15 = arith.constant 0 : index
    %23 = vector.load %arg6[%c0_14, %c0_15] : memref<16x32xf32, #tpu.memory_space<vmem>>, vector<16x32xf32>
    tpu.vector_store %arg6[%c0_14, %c0_15], %22 {strides = array<i32>} : memref<16x32xf32, #tpu.memory_space<vmem>>, vector<16x32xf32>,
    return
  }
  func.func @transform_0(%arg0: i32) -> (i32, i32) {
    %c0_i32 = arith.constant 0 : i32
    %c0_i32_0 = arith.constant 0 : i32
    return %arg0, %c0_i32 : i32, i32
  }
  func.func @transform_1(%arg0: i32) -> (i32, i32) {
    %c0_i32 = arith.constant 0 : i32
    %c0_i32_0 = arith.constant 0 : i32
    %c0_i32_1 = arith.constant 0 : i32
    return %c0_i32, %c0_i32_0 : i32, i32
  }
  func.func @transform_2(%arg0: i32) -> (i32, i32) {
    %c0_i32 = arith.constant 0 : i32
    %c0_i32_0 = arith.constant 0 : i32
    %c0_i32_1 = arith.constant 0 : i32
    return %c0_i32, %c0_i32_0 : i32, i32
  }
  func.func @transform_3(%arg0: i32) -> (i32, i32) {
    %c0_i32 = arith.constant 0 : i32
    %c0_i32_0 = arith.constant 0 : i32
    %c0_i32_1 = arith.constant 0 : i32
    return %c0_i32, %c0_i32_0 : i32, i32
  }
  func.func @transform_4(%arg0: i32) -> (i32, i32) {
    %c0_i32 = arith.constant 0 : i32
    %c0_i32_0 = arith.constant 0 : i32
    %c0_i32_1 = arith.constant 0 : i32
    return %c0_i32, %c0_i32_0 : i32, i32
  }
  func.func @transform_5(%arg0: i32) -> (i32, i32) {
    %c0_i32 = arith.constant 0 : i32
    %c0_i32_0 = arith.constant 0 : i32
    return %arg0, %c0_i32 : i32, i32
  }
}

</mosaic_0001>

<bundles_post_ra>
// kernel: _se_mask_call.1
= control target key start
LH: loop header
LB: loop body
LE: loop exit
PB: predicated region body
PF: predicated region fallthrough
CT: control target
= control target key end

     0   :  { %10 = vsyncpa [#allocation3], 0  ;;  %s417_s0 = inlined_call_operand.hbm [shape: f32[16,32], index: 0, kind: input, shape index: {}]   ;;  %s418_s1 = inlined_call_operand.hbm [shape: f32[32,256], index: 1, kind: input, shape index: {}]   ;;  %s419_s2 = inlined_call_operand.vmem [shape: f32[1,128], index: 2, kind: input, shape index: {}]   ;;  %s420_s3 = inlined_call_operand.hbm [shape: f32[128,128], index: 3, kind: input, shape index: {}]   ;;  %s421_s4 = inlined_call_operand.vmem [shape: f32[1,128], index: 4, kind: input, shape index: {}]   ;;  %s422_s5 = inlined_call_operand.hbm [shape: f32[16,32], index: 5, kind: output, shape index: {}]  }
   0x1   :  { %11 = vsyncpa [#allocation6], 0  ;;  %s30_s20 = sshll.u32 %s418_s1, 4  ;;  %s31_s20 = int_to_ptr.hbm [resolvable:$true] %s30_s20 }
   0x2   :  { %12 = vsyncpa [#allocation4], 0  ;;  %s346_s21 = smov [#allocation5]   ;;  %s17_s25 = sshll.u32 %s417_s0, 4  ;;  %s18_s25 = int_to_ptr.hbm [resolvable:$true] %s17_s25 }
   0x3   :  { %s32_s22 = sshll.u32 %s346_s21, 4  ;;  %s347_s26 = smov 256   ;;  %s33_s22 = int_to_ptr.vmem [resolvable:$true] %s32_s22 }
   0x4   :  { %s348_s27 = smov 16   ;;  %s349_s28 = smov [#allocation2]  }
   0x5   :  { %38 = dma.hbm_to_vmem [thread:$0]  %s31_s20, 1024, %s33_s22, [#allocation6], %s347_s26, %s347_s26, %s348_s27  }
   0x6   :  { %s19_s29 = sshll.u32 %s349_s28, 4  ;;  %s350_s30 = smov 128   ;;  %s20_s29 = int_to_ptr.vmem [resolvable:$true] %s19_s29 }
   0x7   :  { %s351_s6 = smov 8   ;;  %s45_s8 = sshll.u32 %s420_s3, 4  ;;  %s46_s8 = int_to_ptr.hbm [resolvable:$true] %s45_s8 }
   0x8   :  { %25 = dma.hbm_to_vmem [thread:$0]  %s18_s25, 256, %s20_s29, [#allocation3], %s350_s30, %s350_s30, %s351_s6  }
   0x9   :  { %s352_s9 = smov [#allocation7]  }
   0xa   :  { %s47_s0 = sshll.u32 %s352_s9, 4  ;;  %s48_s0 = int_to_ptr.vmem [resolvable:$true] %s47_s0 }
   0xb   :  { %53 = dma.hbm_to_vmem [thread:$0]  %s46_s8, 2048, %s48_s0, [#allocation6], %s350_s30, %s350_s30, %s351_s6  }
   0xc   :  { %340 = dma.done.wait [#allocation3], 256  }
   0xd   :  { %341 = vsyncadd [#allocation3], 4294967040 }
   0xe   :  { %342 = dma.done.wait [#allocation6], 3072  }
   0xf   :  { %343 = vsyncadd [#allocation6], 4294964224  ;;  %v76_v0 = vld [vmem:[#allocation5 + $0x30] sm:$0xff]  ;;  %v74_v1 = vld [vmem:[#allocation5 + $0x20] sm:$0xff]  ;;  %vm78_vm0 = vcmask 261120   ;;  %s200_s16 = sshll.u32 %s422_s5, 4  ;;  %s201_s16 = int_to_ptr.hbm [resolvable:$true] %s200_s16 }
  0x10   :  { %97 = vmatpush.msra.mxu0 %v76_v0  ;;  %v72_v2 = vld [vmem:[#allocation5 + $0x10] sm:$0xff]  ;;  %v154_v3 = vld [vmem:[#allocation7 + $0x78] sm:$0xff]  ;;  %v70_v5 = vld [vmem:[#allocation5] sm:$0xff] }
  0x11   :  { %v153_v4 = vld [vmem:[#allocation7 + $0x70] sm:$0xff]  ;;  %155 = vmatpush.msra.mxu2 %v154_v3  ;;  %v152_v6 = vld [vmem:[#allocation7 + $0x68] sm:$0xff]  ;;  %218 = vmatpush.msra.mxu3 %v154_v3  ;;  %v151_v8 = vld [vmem:[#allocation7 + $0x60] sm:$0xff] }
  0x12   :  { %98 = vmatpush.msra.mxu0 %v74_v1  ;;  %v68_v7 = vld [vmem:[#allocation2] sm:$0xff]  ;;  %v150_v9 = vld [vmem:[#allocation7 + $0x58] sm:$0xff]  ;;  %v148_v11 = vld [vmem:[#allocation7 + $0x48] sm:$0xff] }
  0x13   :  { %156 = vmatpush.msra.mxu2 %v153_v4  ;;  %219 = vmatpush.msra.mxu3 %v153_v4  ;;  %v149_v10 = vld [vmem:[#allocation7 + $0x50] sm:$0xff]  ;;  %v69_v12 = vld [vmem:[#allocation2 + $0x8] sm:$0xff]  ;;  %v147_v13 = vld [vmem:[#allocation7 + $0x40] sm:$0xff] }
  0x14   :  { %99 = vmatpush.msra.mxu0 %v72_v2  ;;  %v146_v14 = vld [vmem:[#allocation7 + $0x38] sm:$0xff]  ;;  %v145_v15 = vld [vmem:[#allocation7 + $0x30] sm:$0xff]  ;;  %v144_v16 = vld [vmem:[#allocation7 + $0x28] sm:$0xff] }
  0x15   :  { %157 = vmatpush.msra.mxu2 %v152_v6  ;;  %220 = vmatpush.msra.mxu3 %v152_v6  ;;  %v143_v17 = vld [vmem:[#allocation7 + $0x20] sm:$0xff]  ;;  %v142_v18 = vld [vmem:[#allocation7 + $0x18] sm:$0xff]  ;;  %v141_v19 = vld [vmem:[#allocation7 + $0x10] sm:$0xff] }
  0x16   :  { %100 = vmatpush.msra.mxu0 %v70_v5  ;;  %v140_v20 = vld [vmem:[#allocation7 + $0x8] sm:$0xff]  ;;  %v77_v21 = vld [vmem:[#allocation5 + $0x38] sm:$0xff]  ;;  %v139_v22 = vld [vmem:[#allocation7] sm:$0xff] }
  0x17   :  { %214 = vmatmul.msk.f32.vlgmr.msra.gmra.mxu0 %vm78_vm0, %v68_v7  ;;  %158 = vmatpush.msra.mxu2 %v151_v8  ;;  %v75_v23 = vld [vmem:[#allocation5 + $0x28] sm:$0xff]  ;;  %v73_v24 = vld [vmem:[#allocation5 + $0x18] sm:$0xff]  ;;  %v242_v26 = vld [vmem:[%s419_s2] ss:$0 sm:$0xff]  ;;  %s353_s2 = smov [#allocation8]  }
  0x18   :  { %221 = vmatpush.msra.mxu3 %v151_v8  ;;  %120 = vmatpush.msra.mxu1 %v77_v21  ;;  %v71_v25 = vld [vmem:[#allocation5 + $0x8] sm:$0xff]  ;;  %v243_v34 = vld [vmem:[%s421_s4] ss:$0 sm:$0xff]  ;;  %s198_s13 = sshll.u32 %s353_s2, 4  ;;  %s199_s13 = int_to_ptr.vmem [resolvable:$true] %s198_s13 }
  0x19   :  { %159 = vmatpush.msra.mxu2 %v150_v9 }
  0x1a   :  { %222 = vmatpush.msra.mxu3 %v150_v9  ;;  %121 = vmatpush.msra.mxu1 %v75_v23 }
  0x1b   :  { %160 = vmatpush.msra.mxu2 %v149_v10 }
  0x1c   :  { %223 = vmatpush.msra.mxu3 %v149_v10  ;;  %122 = vmatpush.msra.mxu1 %v73_v24 }
  0x1d   :  { %161 = vmatpush.msra.mxu2 %v148_v11 }
  0x1e   :  { %224 = vmatpush.msra.mxu3 %v148_v11  ;;  %123 = vmatpush.msra.mxu1 %v71_v25 }
  0x1f   :  { %215 = vmatmul.msk.f32.gmra.mxu0 %vm78_vm0, %v69_v12  ;;  %162 = vmatpush.msra.mxu2 %v147_v13 }
  0x20   :  { %225 = vmatpush.msra.mxu3 %v147_v13  ;;  %216 = vmatmul.msk.f32.vlgmr.msra.gmra.mxu1 %vm78_vm0, %v68_v7 }
  0x21   :  { %163 = vmatpush.msra.mxu2 %v146_v14 }
  0x22   :  { %226 = vmatpush.msra.mxu3 %v146_v14 }
  0x23   :  { %164 = vmatpush.msra.mxu2 %v145_v15 }
  0x24   :  { %227 = vmatpush.msra.mxu3 %v145_v15 }
  0x25   :  { %165 = vmatpush.msra.mxu2 %v144_v16 }
  0x26   :  { %228 = vmatpush.msra.mxu3 %v144_v16 }
  0x27   :  { %166 = vmatpush.msra.mxu2 %v143_v17 }
  0x28   :  { %229 = vmatpush.msra.mxu3 %v143_v17  ;;  %217 = vmatmul.msk.f32.gmra.mxu1 %vm78_vm0, %v69_v12 }
  0x29   :  { %167 = vmatpush.msra.mxu2 %v142_v18 }
  0x2a   :  { %230 = vmatpush.msra.mxu3 %v142_v18 }
  0x2b   :  { %168 = vmatpush.msra.mxu2 %v141_v19 }
  0x2c   :  { %231 = vmatpush.msra.mxu3 %v141_v19 }
  0x2d   :  { %169 = vmatpush.msra.mxu2 %v140_v20 }
  0x2e   :  { %232 = vmatpush.msra.mxu3 %v140_v20 }
  0x2f   :  { %170 = vmatpush.msra.mxu2 %v139_v22 }
  0x30   :  { %233 = vmatpush.msra.mxu3 %v139_v22 }
  0x94   :  { %v102_v27 = vpop.f32.mrf.mxu0 }
  0x95   :  { %v135_v28 = vadd.f32 %v242_v26, %v102_v27 }
  0x97   :  { %v137_v29 = vmax.f32 %v135_v28, 0.0 }
  0x99   :  { %171 = vmatmul.f32.vlgmr.msra.gmra.mxu2 %v137_v29 }
  0x9c   :  { %v105_v30 = vpop.f32.mrf.mxu0 }
  0x9d   :  { %v136_v31 = vadd.f32 %v242_v26, %v105_v30  ;;  %v125_v33 = vpop.f32.mrf.mxu1 }
  0x9f   :  { %v138_v32 = vmax.f32 %v136_v31, 0.0 }
  0xa1   :  { %174 = vmatmul.f32.vlgmr.msra.gmra.mxu3 %v138_v32 }
  0xa5   :  { %v128_v39 = vpop.f32.mrf.mxu1 }
 0x11c   :  { %v172_v35 = vpop.f32.mrf.mxu2 }
 0x11d   :  { %v178_v36 = vadd.f32 %v172_v35, %v125_v33 }
 0x11f   :  { %v184_v37 = vadd.f32 %v243_v34, %v178_v36 }
 0x121   :  { %v186_v38 = vmax.f32 %v184_v37, 0.0 }
 0x123   :  { %v188_v40 = vmin.f32 %v186_v38, 6.0 }
 0x124   :  { %v175_v41 = vpop.f32.mrf.mxu3 }
 0x125   :  { %v190_v42 = vmul.f32 0.16666667, %v188_v40  ;;  %v179_v43 = vadd.f32 %v175_v41, %v128_v39 }
 0x127   :  { %192 = vst.msk [vmem:[#allocation8] sm:$0xff] %vm78_vm0, %v190_v42  ;;  %v185_v44 = vadd.f32 %v243_v34, %v179_v43 }
 0x129   :  { %v187_v45 = vmax.f32 %v185_v44, 0.0 }
 0x12b   :  { %v189_v46 = vmin.f32 %v187_v45, 6.0 }
 0x12d   :  { %v191_v47 = vmul.f32 0.16666667, %v189_v46 }
 0x12f   :  { %193 = vst.msk [vmem:[#allocation8 + $0x8] sm:$0xff] %vm78_vm0, %v191_v47 }
 0x130   :  { %206 = dma.vmem_to_hbm [thread:$0]  %s199_s13, 256, %s201_s16, [#allocation4], %s350_s30, %s350_s30, %s351_s6  }
 0x131   :  { %344 = dma.done.wait [#allocation4], 256  }
 0x132   :  { %345 = vsyncadd [#allocation4], 4294967040 }
 0x133   :  { %211 = vsyncpa [#allocation3], 1 }
 0x134   :  { %212 = vsyncpa [#allocation6], 1 }
 0x135   :  { %213 = vsyncpa [#allocation4], 1 }

</bundles_post_ra>
